<compile_context>
chip_gen: v7x
topology: tpu7x:2x2x1
jax: 0.10.0
libtpu: 0.0.40
codegen_flags: <defaults>
</compile_context>

<pallas_src>
import functools

import jax
import jax.numpy as jnp
from jax.experimental import pallas as pl
from jax.experimental.pallas import tpu as pltpu


def _rmsnorm_kernel(x_ref, w_ref, o_ref, *, eps, inv_dim):
    # x_ref: (tile_rows, dim)  w_ref: (1, dim)  o_ref: (tile_rows, dim)
    x = x_ref[...]
    xf = x.astype(jnp.float32)
    # Sum-of-squares reduction in f32; fold 1/dim into the per-row scalar.
    mean_sq = jnp.sum(xf * xf, axis=-1, keepdims=True) * inv_dim   # (tr, 1)
    norm = jnp.sqrt(mean_sq) + eps                                  # eps outside sqrt (PyTorch ref)

    out_is_f32 = o_ref.dtype == jnp.float32
    # Per-row reciprocal: only (tr, 1) values; exact for f32 outputs, EUP-approx
    # otherwise (well within bf16 precision).
    inv = pl.reciprocal(norm, approx=not out_is_f32)                # (tr, 1)

    w = w_ref[...]
    if out_is_f32:
        y = (xf * inv) * w.astype(jnp.float32)
    else:
        # Low-precision path: apply the per-row scale + weight in native dtype
        # to avoid materializing a second full f32 (tr, dim) temporary.
        y = (x * inv.astype(x.dtype)) * w.astype(x.dtype)
    o_ref[...] = y.astype(o_ref.dtype)


def _round_up(x, m):
    return (x + m - 1) // m * m


def _vmem_capacity_bytes():
    try:
        return int(pltpu.get_tpu_info().vmem_capacity_bytes)
    except Exception:
        return 64 * 1024 * 1024  # conservative fallback (v7x-sized)


def _pick_tile_rows(rows, dim, itemsize):
    # Sublane packing: 8 rows/vreg-tile for 4B dtypes, 16 for 2B, 32 for 1B.
    row_align = 8 * max(1, 4 // itemsize)
    vmem_cap = _vmem_capacity_bytes()
    # ~4 blocks live (double-buffered in + out) plus f32 temporaries ->
    # keep a single block to <= vmem_cap/16, capped at 8 MiB.
    block_cap = min(vmem_cap // 16, 8 * 1024 * 1024)
    max_tr = max(row_align, block_cap // max(1, dim * itemsize))
    max_tr = max(row_align, (max_tr // row_align) * row_align)
    # Never larger than the (sublane-rounded) total row count.
    tr = min(max_tr, _round_up(rows, row_align))
    return max(tr, row_align)


def rmsnorm(x, weight, eps=1e-8, tile_rows=None):
    """x: (..., dim), weight: (dim,). Returns same shape/dtype as x."""
    orig_shape = x.shape
    dim = orig_shape[-1]
    rows = 1
    for s in orig_shape[:-1]:
        rows *= s
    x2d = x.reshape(rows, dim)
    w2d = weight.reshape(1, dim)

    itemsize = jnp.dtype(x.dtype).itemsize
    row_align = 8 * max(1, 4 // itemsize)
    if tile_rows is None:
        tr = _pick_tile_rows(rows, dim, itemsize)
    else:
        tr = max(row_align, _round_up(int(tile_rows), row_align))

    # Ragged row counts: pl.cdiv grid, Pallas masks the partial last block.
    grid = (pl.cdiv(rows, tr),)

    # Scoped VMEM: double-buffered in/out blocks + f32 temporaries + headroom,
    # clamped below the physical capacity.
    vmem_cap = _vmem_capacity_bytes()
    need = 8 * tr * dim * 4 + (8 << 20)
    vmem_limit = int(min(vmem_cap - (8 << 20), max(32 << 20, need)))

    kernel = functools.partial(_rmsnorm_kernel, eps=eps, inv_dim=1.0 / dim)

    out2d = pl.pallas_call(
        kernel,
        out_shape=jax.ShapeDtypeStruct((rows, dim), x.dtype),
        grid_spec=pltpu.PrefetchScalarGridSpec(
            num_scalar_prefetch=0,
            grid=grid,
            in_specs=[
                pl.BlockSpec((tr, dim), lambda i: (i, 0)),
                # Constant block index: Pallas skips the re-DMA of the weight
                # row across grid steps.
                pl.BlockSpec((1, dim), lambda i: (0, 0)),
            ],
            out_specs=pl.BlockSpec((tr, dim), lambda i: (i, 0)),
        ),
        compiler_params=pltpu.CompilerParams(
            dimension_semantics=("parallel",),
            vmem_limit_bytes=vmem_limit,
        ),
    )(x2d, w2d)

    return out2d.reshape(orig_shape)


def rmsnorm_ref(x, weight, eps=1e-8):
    xf = x.astype(jnp.float32)
    norm = jnp.sqrt(jnp.mean(xf * xf, axis=-1, keepdims=True)) + eps
    return (weight.astype(jnp.float32) * (xf / norm)).astype(x.dtype)


if __name__ == "__main__":
    key = jax.random.PRNGKey(0)
    k1, k2, k3 = jax.random.split(key, 3)
    eps = 1e-8

    # Test 1: small shape matching the module example (batch=2, seq=8, dim=32).
    x1 = jax.random.normal(k1, (2, 8, 32), dtype=jnp.float32)
    w1 = jnp.ones((32,), dtype=jnp.float32)  # nn.Parameter(torch.ones(dim))
    o1 = jax.block_until_ready(rmsnorm(x1, w1, eps=eps))
    r1 = rmsnorm_ref(x1, w1, eps=eps)
    assert o1.shape == x1.shape and o1.dtype == x1.dtype
    assert jnp.allclose(o1, r1, atol=1e-5, rtol=1e-5), "f32 small-dim mismatch"

    # Test 2: lane-aligned dim (multiple of 128) with a ragged row count
    # (3*6 = 18 rows, not a multiple of 8) -> exercises the partial last block.
    x2 = jax.random.normal(k2, (3, 6, 256), dtype=jnp.float32)
    w2 = jax.random.normal(k3, (256,), dtype=jnp.float32)
    o2 = jax.block_until_ready(rmsnorm(x2, w2, eps=eps))
    r2 = rmsnorm_ref(x2, w2, eps=eps)
    assert jnp.allclose(o2, r2, atol=1e-5, rtol=1e-5), "f32 ragged-rows mismatch"

    # Test 3: bf16 path (reduction in f32, elementwise tail in bf16).
    x3 = x2.astype(jnp.bfloat16)
    w3 = w2.astype(jnp.bfloat16)
    o3 = jax.block_until_ready(rmsnorm(x3, w3, eps=eps))
    r3 = rmsnorm_ref(x3, w3, eps=eps)
    assert o3.dtype == jnp.bfloat16
    assert jnp.allclose(o3.astype(jnp.float32), r3.astype(jnp.float32),
                        atol=5e-2, rtol=5e-2), "bf16 mismatch"

    print("KERNEL_OK")
</pallas_src>

<mosaic_0001>
module attributes {stable_mosaic.version = 11 : i64} {
  func.func @_rmsnorm_kernel(%arg0: i32, %arg1: memref<16x32xf32, #tpu.memory_space<vmem>>, %arg2: memref<1x32xf32, #tpu.memory_space<vmem>>, %arg3: memref<16x32xf32, #tpu.memory_space<vmem>>) attributes {dimension_semantics = [#tpu.dimension_semantics<parallel>], iteration_bounds = array<i64: 1>, scalar_prefetch = 0 : i64, scratch_operands = 0 : i64, tpu.core_type = #tpu.core_type<tc>, window_params = [{transform_indices = @transform_0, window_bounds = array<i64: 16, 32>}, {pipeline_mode = #tpu.pipeline_mode<synchronous>, transform_indices = @transform_1, window_bounds = array<i64: 1, 32>}, {transform_indices = @transform_2, window_bounds = array<i64: 16, 32>}]} {
    %c0 = arith.constant 0 : index
    %c0_0 = arith.constant 0 : index
    %0 = vector.load %arg1[%c0, %c0_0] : memref<16x32xf32, #tpu.memory_space<vmem>>, vector<16x32xf32>
    %1 = arith.mulf %0, %0 : vector<16x32xf32>
    %cst = arith.constant dense<0.000000e+00> : vector<16xf32>
    %2 = vector.multi_reduction <add>, %1, %cst [1] : vector<16x32xf32> to vector<16xf32>
    %3 = vector.shape_cast %2 : vector<16xf32> to vector<16x1xf32>
    %cst_1 = arith.constant 3.125000e-02 : f32
    %4 = vector.broadcast %cst_1 : f32 to vector<16x1xf32>
    %5 = arith.mulf %3, %4 : vector<16x1xf32>
    %6 = math.sqrt %5 : vector<16x1xf32>
    %cst_2 = arith.constant 9.99999993E-9 : f32
    %7 = vector.broadcast %cst_2 : f32 to vector<16x1xf32>
    %8 = arith.addf %6, %7 : vector<16x1xf32>
    %9 = tpu.reciprocal %8 : vector<16x1xf32> -> vector<16x1xf32>
    %c0_3 = arith.constant 0 : index
    %c0_4 = arith.constant 0 : index
    %10 = vector.load %arg2[%c0_3, %c0_4] : memref<1x32xf32, #tpu.memory_space<vmem>>, vector<1x32xf32>
    %11 = vector.broadcast %9 : vector<16x1xf32> to vector<16x32xf32>
    %12 = arith.mulf %0, %11 : vector<16x32xf32>
    %13 = vector.broadcast %10 : vector<1x32xf32> to vector<16x32xf32>
    %14 = arith.mulf %12, %13 : vector<16x32xf32>
    %c0_5 = arith.constant 0 : index
    %c0_6 = arith.constant 0 : index
    %15 = vector.load %arg3[%c0_5, %c0_6] : memref<16x32xf32, #tpu.memory_space<vmem>>, vector<16x32xf32>
    tpu.vector_store %arg3[%c0_5, %c0_6], %14 {strides = array<i32>} : memref<16x32xf32, #tpu.memory_space<vmem>>, vector<16x32xf32>,
    return
  }
  func.func @transform_0(%arg0: i32) -> (i32, i32) {
    %c0_i32 = arith.constant 0 : i32
    %c0_i32_0 = arith.constant 0 : i32
    return %arg0, %c0_i32 : i32, i32
  }
  func.func @transform_1(%arg0: i32) -> (i32, i32) {
    %c0_i32 = arith.constant 0 : i32
    %c0_i32_0 = arith.constant 0 : i32
    %c0_i32_1 = arith.constant 0 : i32
    return %c0_i32, %c0_i32_0 : i32, i32
  }
  func.func @transform_2(%arg0: i32) -> (i32, i32) {
    %c0_i32 = arith.constant 0 : i32
    %c0_i32_0 = arith.constant 0 : i32
    return %arg0, %c0_i32 : i32, i32
  }
}

</mosaic_0001>

<bundles_post_ra>
// kernel: tpu_custom_call.1
= control target key start
LH: loop header
LB: loop body
LE: loop exit
PB: predicated region body
PF: predicated region fallthrough
CT: control target
= control target key end

     0   :  { %7 = vsyncpa [#allocation3], 0  ;;  %s204_s0 = inlined_call_operand.hbm [shape: f32[16,32], index: 0, kind: input, shape index: {}]   ;;  %s205_s1 = inlined_call_operand.vmem [shape: f32[1,32], index: 1, kind: input, shape index: {}]   ;;  %s206_s2 = inlined_call_operand.hbm [shape: f32[16,32], index: 2, kind: output, shape index: {}]  }
   0x1   :  { %8 = vsyncpa [#allocation4], 0  ;;  %s148_s9 = smov [#allocation2]   ;;  %s100_s13 = scalar_lea.hbm %s204_s0, 256 }
   0x2   :  { %s14_s10 = sshll.u32 %s148_s9, 4  ;;  %p101_p0 = scmp.ne.s32.totalorder %s204_s0, %s100_s13  ;;  %s15_s10 = int_to_ptr.vmem [resolvable:$true] %s14_s10 }
   0x3   :  { %p104_p1 = scmp.lt.u32.totalorder %s100_s13, %s204_s0 }
   0x5   :  { %p106_p2 = pnand %p104_p1, %p101_p0 }
   0x7   :  { %109 = shalt.err (!%p106_p2)
}
   0x8   :  { %s110_s18 = scalar_lea.vmem %s15_s10, 256  ;;  %p115_p4 = scmp.lt.s32.totalorder %s15_s10, %s15_s10 }
   0x9   :  { %p111_p3 = scmp.ne.s32.totalorder %s15_s10, %s110_s18  ;;  %p116_p5 = scmp.lt.s32.totalorder %s110_s18, %s110_s18 }
   0xb   :  { %p117_p6 = por %p116_p5, %p115_p4 }
   0xd   :  { %p118_p7 = pnand %p117_p6, %p111_p3 }
   0xf   :  { %121 = shalt.err (!%p118_p7)
}
  0x10   :  { %s149_s19 = smov 128   ;;  %s150_s20 = smov 8  }
  0x11   :  { %20 = dma.hbm_to_vmem [thread:$0]  %s204_s0, 256, %s15_s10, [#allocation3], %s149_s19, %s149_s19, %s150_s20  }
  0x12   :  { %144 = dma.done.wait [#allocation3], 256  }
  0x13   :  { %145 = vsyncadd [#allocation3], 4294967040  ;;  %v26_v0 = vld [vmem:[#allocation2] sm:$0xff]  ;;  %vm30_vm0 = vcmask 261120   ;;  %v27_v1 = vld [vmem:[#allocation2 + $0x8] sm:$0xff]  ;;  %s151_s24 = smov [#allocation5]  }
  0x14   :  { %v28_v2 = vmul.f32 %v26_v0, %v26_v0  ;;  %v29_v3 = vmul.f32 %v27_v1, %v27_v1  ;;  %v87_v23 = vld [vmem:[%s205_s1] ss:$0 sm:$0xff]  ;;  %s75_s25 = sshll.u32 %s151_s24, 4  ;;  %s76_s25 = int_to_ptr.vmem [resolvable:$true] %s75_s25 }
  0x15   :  { %s122_s26 = scalar_lea.vmem %s76_s25, 256  ;;  %p127_p9 = scmp.lt.s32.totalorder %s76_s25, %s76_s25 }
  0x16   :  { %v31_v4 = vsel %vm30_vm0, %v28_v2, 0.0  ;;  %v34_v5 = vsel %vm30_vm0, %v29_v3, 0.0  ;;  %p123_p8 = scmp.ne.s32.totalorder %s76_s25, %s122_s26  ;;  %p128_p10 = scmp.lt.s32.totalorder %s122_s26, %s122_s26 }
  0x17   :  { %32 = vadd.xlane.f32.xlu0 %v31_v4 }
  0x18   :  { %p129_p11 = por %p128_p10, %p127_p9 }
  0x1a   :  { %p130_p12 = pnand %p129_p11, %p123_p8 }
  0x1b   :  { %35 = vadd.xlane.f32.xlu0 %v34_v5 }
  0xa4   :  { %v33_v6 = vpop.xlane.xlu0 %32 }
  0xa5   :  { %v37_v7 = vmul.f32 0.03125, %v33_v6 }
  0xa7   :  { %92 = vrsqrt.f32 %v37_v7  ;;  %vm41_vm1 = vcmp.eq.f32.partialorder %v37_v7, inf  ;;  %v44_v12 = vand.u32 2147483648, %v37_v7  ;;  %vm43_vm2 = vcmp.eq.f32.partialorder %v37_v7, 0.0 }
  0xa8   :  { %v36_v8 = vpop.xlane.xlu0 %35 }
  0xa9   :  { %v38_v9 = vmul.f32 0.03125, %v36_v8 }
  0xab   :  { %94 = vrsqrt.f32 %v38_v9  ;;  %vm48_vm3 = vcmp.eq.f32.partialorder %v38_v9, inf  ;;  %v51_v18 = vand.u32 2147483648, %v38_v9  ;;  %vm50_vm4 = vcmp.eq.f32.partialorder %v38_v9, 0.0 }
  0xb1   :  { %v93_v10 = vpop.eup %92 }
  0xb2   :  { %v40_v11 = vmul.f32 %v93_v10, %v37_v7 }
  0xb4   :  { %v42_v13 = vsel %vm41_vm1, %v37_v7, %v40_v11 }
  0xb5   :  { %v95_v14 = vpop.eup %94  ;;  %v45_v15 = vsel %vm43_vm2, %v44_v12, %v42_v13 }
  0xb6   :  { %v53_v16 = vadd.f32 1e-08, %v45_v15  ;;  %v47_v17 = vmul.f32 %v95_v14, %v38_v9 }
  0xb8   :  { %v49_v19 = vsel %vm48_vm3, %v38_v9, %v47_v17  ;;  %96 = vrcp.f32 %v53_v16 }
  0xb9   :  { %v52_v20 = vsel %vm50_vm4, %v51_v18, %v49_v19 }
  0xba   :  { %v54_v21 = vadd.f32 1e-08, %v52_v20 }
  0xbc   :  { %98 = vrcp.f32 %v54_v21 }
  0xc2   :  { %v97_v22 = vpop.eup %96 }
  0xc3   :  { %v58_v24 = vmul.f32 %v97_v22, %v26_v0 }
  0xc5   :  { %v66_v25 = vmul.f32 %v87_v23, %v58_v24 }
  0xc6   :  { %v99_v26 = vpop.eup %98 }
  0xc7   :  { %v59_v27 = vmul.f32 %v99_v26, %v27_v1  ;;  %68 = vst.msk [vmem:[#allocation5] sm:$0xff] %vm30_vm0, %v66_v25 }
  0xc9   :  { %v67_v28 = vmul.f32 %v87_v23, %v59_v27 }
  0xcb   :  { %69 = vst.msk [vmem:[#allocation5 + $0x8] sm:$0xff] %vm30_vm0, %v67_v28 }
  0xcc   :  { %133 = shalt.err (!%p130_p12)
}
  0xcd   :  { %s134_s28 = scalar_lea.hbm %s206_s2, 256 }
  0xce   :  { %p135_p13 = scmp.ne.s32.totalorder %s206_s2, %s134_s28  ;;  %p138_p0 = scmp.lt.u32.totalorder %s134_s28, %s206_s2 }
  0xd0   :  { %p140_p1 = pnand %p138_p0, %p135_p13 }
  0xd2   :  { %143 = shalt.err (!%p140_p1)
}
  0xd3   :  { %81 = dma.vmem_to_hbm [thread:$0]  %s76_s25, 256, %s206_s2, [#allocation4], %s149_s19, %s149_s19, %s150_s20  }
  0xd4   :  { %146 = dma.done.wait [#allocation4], 256  }
  0xd5   :  { %147 = vsyncadd [#allocation4], 4294967040 }
  0xd6   :  { %85 = vsyncpa [#allocation3], 1 }
  0xd7   :  { %86 = vsyncpa [#allocation4], 1 }

</bundles_post_ra>
